<compile_context>
chip_gen: v6e
topology: v6e:2x2x1
jax: 0.10.0
libtpu: 0.0.40
codegen_flags: <defaults>
</compile_context>

<pallas_src>
import jax
import jax.numpy as jnp
from jax.experimental import pallas as pl
from jax.experimental.pallas import tpu as pltpu


def _sim_loss_kernel(sim_ref, a_ref, out_ref):
    """Reduce one [BM, N, N] block to a single scalar partial sum of `obj`."""
    n = sim_ref.shape[2]                                   # static Python int
    sim = sim_ref[...].astype(jnp.float32)                 # [BM, N, N]
    a_tf = (a_ref[...] != 0).astype(jnp.float32)           # [BM, N, N]

    # term1: N * sum over the whole block of A_tf * sim
    masked_sum = jnp.sum(a_tf * sim)                       # scalar

    # per-slice nonzero count and per-slice sum of row log-sum-exp
    sum_a = jnp.sum(jnp.sum(a_tf, axis=2), axis=1, keepdims=True)   # [BM, 1]
    lse = jnp.log(jnp.sum(jnp.exp(sim), axis=2))                    # [BM, N]
    sum_lse = jnp.sum(lse, axis=1, keepdims=True)                   # [BM, 1]
    term2 = jnp.sum(sum_a * sum_lse)                       # scalar

    partial = jnp.float32(n) * masked_sum - term2
    out_ref[...] = jnp.broadcast_to(partial, (1, 1, 1)).astype(jnp.float32)


def sim_loss(sim_matrix, A):
    """Pallas implementation of sim_loss.forward(sim_matrix, A)."""
    M, N, _ = sim_matrix.shape

    # A is only used as an (A != 0) mask -> send it as int8 to cut HBM traffic.
    a_mask = (A != 0).astype(jnp.int8)
    sim_f32 = sim_matrix.astype(jnp.float32)

    # Batch BM slices per grid step so each DMA is large; keep the
    # double-buffered inputs (f32 sim + int8 mask) under ~32 MiB so the same
    # tiling fits v5e/v6e (128 MiB VMEM) and v7x (64 MiB VMEM).
    per_slice_bytes = N * N * (4 + 1)
    bm = int(max(1, min(M, (32 << 20) // (2 * per_slice_bytes))))

    # Pad M up to a multiple of BM.  Padded slices have A == 0 and sim == 0,
    # so both algebraic terms contribute exactly zero to the sum.
    g = -(-M // bm)                     # cdiv
    m_pad = g * bm
    if m_pad != M:
        sim_f32 = jnp.pad(sim_f32, ((0, m_pad - M), (0, 0), (0, 0)))
        a_mask = jnp.pad(a_mask, ((0, m_pad - M), (0, 0), (0, 0)))

    partials = pl.pallas_call(
        _sim_loss_kernel,
        out_shape=jax.ShapeDtypeStruct((g, 1, 1), jnp.float32),
        grid_spec=pltpu.PrefetchScalarGridSpec(
            num_scalar_prefetch=0,
            grid=(g,),
            in_specs=[
                pl.BlockSpec((bm, N, N), lambda b: (b, 0, 0)),
                pl.BlockSpec((bm, N, N), lambda b: (b, 0, 0)),
            ],
            out_specs=pl.BlockSpec((1, 1, 1), lambda b: (b, 0, 0)),
        ),
        compiler_params=pltpu.CompilerParams(
            dimension_semantics=("parallel",),   # independent blocks -> megacore on v7x
            vmem_limit_bytes=48 << 20,           # above v5e's 16 MiB default, within v7x's 64 MiB
        ),
    )(sim_f32, a_mask)

    # Combine per-block partials outside the kernel; divide by the ORIGINAL M.
    return (-1.0 / M) * jnp.sum(partials)


def sim_loss_ref(sim_matrix, A, epsilon=1e-08):
    """Pure-JAX reference, mirrors the PyTorch module line by line."""
    A_tf = (A != 0).astype(jnp.float32)
    M = sim_matrix.shape[0]
    abs_N = jnp.sum(A_tf, axis=1, keepdims=True)
    logexp_S = jnp.log(jnp.sum(jnp.exp(sim_matrix), axis=2, keepdims=True))
    obj_vector = jnp.sum(A_tf * sim_matrix, axis=2, keepdims=True) - abs_N * logexp_S
    return -(1.0 / M) * jnp.sum(obj_vector)


if __name__ == "__main__":
    # sim_loss has no learnable parameters -> only inputs are constructed.
    M, N = 2, 16
    key = jax.random.PRNGKey(0)
    k_sim, k_adj = jax.random.split(key)
    sim_matrix = jax.random.normal(k_sim, (M, N, N), dtype=jnp.float32)
    # Sparse-ish adjacency with zeros so that (A != 0) is non-trivial.
    A = (jax.random.uniform(k_adj, (M, N, N)) > 0.5).astype(jnp.float32)

    loss = sim_loss(sim_matrix, A)
    jax.block_until_ready(loss)

    ref = sim_loss_ref(sim_matrix, A)
    assert jnp.allclose(loss, ref, rtol=1e-5, atol=1e-5), (loss, ref)
    print("KERNEL_OK")
</pallas_src>

<mosaic_0001>
module attributes {stable_mosaic.version = 11 : i64} {
  func.func @_sim_loss_kernel(%arg0: i32, %arg1: memref<2x16x16xf32, #tpu.memory_space<vmem>>, %arg2: memref<2x16x16xi8, #tpu.memory_space<vmem>>, %arg3: memref<1x1x1xf32, #tpu.memory_space<vmem>>) attributes {dimension_semantics = [#tpu.dimension_semantics<parallel>], iteration_bounds = array<i64: 1>, scalar_prefetch = 0 : i64, scratch_operands = 0 : i64, tpu.core_type = #tpu.core_type<tc>, window_params = [{transform_indices = @transform_0, window_bounds = array<i64: 2, 16, 16>}, {transform_indices = @transform_1, window_bounds = array<i64: 2, 16, 16>}, {transform_indices = @transform_2, window_bounds = array<i64: 1, 1, 1>}]} {
    %c0 = arith.constant 0 : index
    %c0_0 = arith.constant 0 : index
    %c0_1 = arith.constant 0 : index
    %0 = vector.load %arg1[%c0, %c0_0, %c0_1] : memref<2x16x16xf32, #tpu.memory_space<vmem>>, vector<2x16x16xf32>
    %c0_2 = arith.constant 0 : index
    %c0_3 = arith.constant 0 : index
    %c0_4 = arith.constant 0 : index
    %1 = vector.load %arg2[%c0_2, %c0_3, %c0_4] : memref<2x16x16xi8, #tpu.memory_space<vmem>>, vector<2x16x16xi8>
    %c0_i8 = arith.constant 0 : i8
    %2 = vector.broadcast %c0_i8 : i8 to vector<2x16x16xi8>
    %3 = arith.cmpi ne, %1, %2 : vector<2x16x16xi8>
    %4 = arith.extui %3 : vector<2x16x16xi1> to vector<2x16x16xi32>
    %5 = arith.sitofp %4 : vector<2x16x16xi32> to vector<2x16x16xf32>
    %6 = arith.mulf %5, %0 : vector<2x16x16xf32>
    %7 = vector.shape_cast %6 : vector<2x16x16xf32> to vector<1x2x16x16xf32>
    %cst = arith.constant dense<0.000000e+00> : vector<1xf32>
    %8 = vector.multi_reduction <add>, %7, %cst [1, 2, 3] : vector<1x2x16x16xf32> to vector<1xf32>
    %9 = vector.shape_cast %8 : vector<1xf32> to vector<1x1x1x1xf32>
    %10 = vector.extract %9[0, 0, 0, 0] : f32 from vector<1x1x1x1xf32>
    %cst_5 = arith.constant dense<0.000000e+00> : vector<2x16xf32>
    %11 = vector.multi_reduction <add>, %5, %cst_5 [2] : vector<2x16x16xf32> to vector<2x16xf32>
    %cst_6 = arith.constant dense<0.000000e+00> : vector<2xf32>
    %12 = vector.multi_reduction <add>, %11, %cst_6 [1] : vector<2x16xf32> to vector<2xf32>
    %13 = vector.shape_cast %12 : vector<2xf32> to vector<2x1xf32>
    %14 = math.exp %0 : vector<2x16x16xf32>
    %cst_7 = arith.constant dense<0.000000e+00> : vector<2x16xf32>
    %15 = vector.multi_reduction <add>, %14, %cst_7 [2] : vector<2x16x16xf32> to vector<2x16xf32>
    %16 = math.log %15 : vector<2x16xf32>
    %cst_8 = arith.constant dense<0.000000e+00> : vector<2xf32>
    %17 = vector.multi_reduction <add>, %16, %cst_8 [1] : vector<2x16xf32> to vector<2xf32>
    %18 = vector.shape_cast %17 : vector<2xf32> to vector<2x1xf32>
    %19 = arith.mulf %13, %18 : vector<2x1xf32>
    %20 = vector.shape_cast %19 : vector<2x1xf32> to vector<1x2x1xf32>
    %cst_9 = arith.constant dense<0.000000e+00> : vector<1xf32>
    %21 = vector.multi_reduction <add>, %20, %cst_9 [1, 2] : vector<1x2x1xf32> to vector<1xf32>
    %22 = vector.shape_cast %21 : vector<1xf32> to vector<1x1x1xf32>
    %23 = vector.extract %22[0, 0, 0] : f32 from vector<1x1x1xf32>
    %cst_10 = arith.constant 1.600000e+01 : f32
    %24 = arith.mulf %cst_10, %10 : f32
    %25 = arith.subf %24, %23 : f32
    %26 = vector.broadcast %25 : f32 to vector<1x1x1xf32>
    %c0_11 = arith.constant 0 : index
    %c0_12 = arith.constant 0 : index
    %c0_13 = arith.constant 0 : index
    %27 = vector.load %arg3[%c0_11, %c0_12, %c0_13] : memref<1x1x1xf32, #tpu.memory_space<vmem>>, vector<1x1x1xf32>
    tpu.vector_store %arg3[%c0_11, %c0_12, %c0_13], %26 {strides = array<i32>} : memref<1x1x1xf32, #tpu.memory_space<vmem>>, vector<1x1x1xf32>,
    return
  }
  func.func @transform_0(%arg0: i32) -> (i32, i32, i32) {
    %c0_i32 = arith.constant 0 : i32
    %c0_i32_0 = arith.constant 0 : i32
    %c0_i32_1 = arith.constant 0 : i32
    return %arg0, %c0_i32, %c0_i32_0 : i32, i32, i32
  }
  func.func @transform_1(%arg0: i32) -> (i32, i32, i32) {
    %c0_i32 = arith.constant 0 : i32
    %c0_i32_0 = arith.constant 0 : i32
    %c0_i32_1 = arith.constant 0 : i32
    return %arg0, %c0_i32, %c0_i32_0 : i32, i32, i32
  }
  func.func @transform_2(%arg0: i32) -> (i32, i32, i32) {
    %c0_i32 = arith.constant 0 : i32
    %c0_i32_0 = arith.constant 0 : i32
    %c0_i32_1 = arith.constant 0 : i32
    return %arg0, %c0_i32, %c0_i32_0 : i32, i32, i32
  }
}

</mosaic_0001>

<bundles_post_ra>
// kernel: tpu_custom_call.1
= control target key start
LH: loop header
LB: loop body
LE: loop exit
PB: predicated region body
PF: predicated region fallthrough
CT: control target
= control target key end

     0   :  { %7 = vsyncpa [#allocation3], 0  ;;  %s392_s0 = inlined_call_operand.hbm [shape: f32[2,16,16], index: 0, kind: input, shape index: {}]   ;;  %s393_s1 = inlined_call_operand.hbm [shape: s8[2,16,16], index: 1, kind: input, shape index: {}]   ;;  %s394_s2 = inlined_call_operand.hbm [shape: f32[1,1,1], index: 2, kind: output, shape index: {}]  }
   0x1   :  { %8 = vsyncpa [#allocation6], 0 }
   0x2   :  { %9 = vsyncpa [#allocation4], 0  ;;  %s327_s9 = smov [#allocation2]  }
   0x3   :  { %s15_s10 = sshll.u32 %s327_s9, 4  ;;  %s16_s10 = int_to_ptr.vmem [resolvable:$true] %s15_s10 }
   0x4   :  { %s269_s11 = scalar_lea.vmem %s16_s10, 512  ;;  %p274_p1 = scmp.lt.s32.totalorder %s16_s10, %s16_s10 }
   0x5   :  { %p270_p0 = scmp.ne.s32.totalorder %s16_s10, %s269_s11  ;;  %p275_p2 = scmp.lt.s32.totalorder %s269_s11, %s269_s11 }
   0x7   :  { %p276_p3 = por %p275_p2, %p274_p1 }
   0x9   :  { %p277_p4 = pnand %p276_p3, %p270_p0 }
   0xb   :  { %280 = shalt.err (!%p277_p4)
}
   0xc   :  { %s328_s12 = smov 128   ;;  %s329_s13 = smov 8  }
   0xd   :  { %21 = dma.hbm_to_vmem [thread:$0]  %s392_s0, 512, %s16_s10, [#allocation3], %s328_s12, %s328_s12, %s329_s13  }
   0xe   :  { %s330_s16 = smov [#allocation5]  }
   0xf   :  { %s27_s17 = sshll.u32 %s330_s16, 4  ;;  %s28_s17 = int_to_ptr.vmem [resolvable:$true] %s27_s17 }
  0x10   :  { %s289_s18 = scalar_lea.vmem %s28_s17, 128  ;;  %p294_p6 = scmp.lt.s32.totalorder %s28_s17, %s28_s17 }
  0x11   :  { %p290_p5 = scmp.ne.s32.totalorder %s28_s17, %s289_s18  ;;  %p295_p7 = scmp.lt.s32.totalorder %s289_s18, %s289_s18 }
  0x13   :  { %p296_p8 = por %p295_p7, %p294_p6 }
  0x15   :  { %p297_p9 = pnand %p296_p8, %p290_p5 }
  0x17   :  { %300 = shalt.err (!%p297_p9)
}
  0x18   :  { %s331_s19 = smov 32   ;;  %s332_s20 = smov 2  }
  0x19   :  { %33 = dma.hbm_to_vmem [thread:$0]  %s393_s1, 128, %s28_s17, [#allocation6], %s331_s19, %s331_s19, %s332_s20  }
  0x1a   :  { %321 = dma.done.wait [#allocation3], 512  }
  0x1b   :  { %322 = vsyncadd [#allocation3], 4294966784 }
  0x1c   :  { %323 = dma.done.wait [#allocation6], 128  }
  0x1d   :  { %324 = vsyncadd [#allocation6], 4294967168  ;;  %v44_v0 = vld [vmem:[#allocation2 + $0x10] sm:$0xff]  ;;  %v42_v1 = vld [vmem:[#allocation2] sm:$0xff]  ;;  %v333_v12 = vmov 0   ;;  %v334_v20 = vmov 0.0   ;;  %v111_v42 = vlaneseq }
  0x1e   :  { %v45_v2 = vld [vmem:[#allocation2 + $0x18] sm:$0xff]  ;;  %v144_v3 = vmul.f32 1.442695, %v44_v0  ;;  %v140_v4 = vmul.f32 1.442695, %v42_v1  ;;  %v43_v6 = vld [vmem:[#allocation2 + $0x8] sm:$0xff] }
  0x1f   :  { %v146_v5 = vmul.f32 1.442695, %v45_v2  ;;  %v47_v7 = vld [vmem:[#allocation5 + $0x2] sm:$0x3]  ;;  %v46_v8 = vld [vmem:[#allocation5] sm:$0x3] }
  0x20   :  { %245 = vpow2.f32 %v144_v3  ;;  %v142_v9 = vmul.f32 1.442695, %v43_v6  ;;  %vm51_vm0 = vnez %v47_v7  ;;  %vm50_vm1 = vnez %v46_v8  ;;  %v49_v10 = vld [vmem:[#allocation5 + $0x6] sm:$0x3]  ;;  %v48_v11 = vld [vmem:[#allocation5 + $0x4] sm:$0x3] }
  0x21   :  { %247 = vpow2.f32 %v140_v4  ;;  %v55_v13 = vsel %vm51_vm0, 16843009, %v333_v12  ;;  %v54_v14 = vsel %vm50_vm1, 16843009, %v333_v12  ;;  %vm53_vm2 = vnez %v49_v10  ;;  %s335_s23 = smov [#allocation7]  }
  0x22   :  { %249 = vpow2.f32 %v146_v5  ;;  %v59_v15 = vunpack.c.0.s8 %v55_v13  ;;  %v58_v16 = vunpack.c.0.s8 %v54_v14  ;;  %v57_v17 = vsel %vm53_vm2, 16843009, %v333_v12  ;;  %s218_s24 = sshll.u32 %s335_s23, 4  ;;  %s219_s24 = int_to_ptr.vmem [resolvable:$true] %s218_s24 }
  0x23   :  { %251 = vpow2.f32 %v142_v9  ;;  %v61_v18 = vunpack.c.0.s8 %v57_v17  ;;  %vm52_vm3 = vnez %v48_v11  ;;  %vm78_vm8 = vcmask 130048   ;;  %s301_s27 = scalar_lea.vmem %s219_s24, 16  ;;  %s305_s28 = scalar_lea.vmem %s219_s24, 32 }
  0x24   :  { %vm63_vm4 = vcmp.ne.s32.totalorder %v59_v15, 0  ;;  %vm62_vm5 = vcmp.ne.s32.totalorder %v58_v16, 0  ;;  %v56_v19 = vsel %vm52_vm3, 16843009, %v333_v12  ;;  %v112_v43 = vand.u32 127, %v111_v42  ;;  %p302_p10 = scmp.ne.s32.totalorder %s219_s24, %s301_s27  ;;  %p306_p11 = scmp.lt.s32.totalorder %s219_s24, %s219_s24 }
  0x25   :  { %v229_v21 = vsel %vm63_vm4, 1.0, %v334_v20  ;;  %v228_v22 = vsel %vm62_vm5, 1.0, %v334_v20  ;;  %vm65_vm6 = vcmp.ne.s32.totalorder %v61_v18, 0  ;;  %v60_v23 = vunpack.c.0.s8 %v56_v19  ;;  %p307_p12 = scmp.lt.s32.totalorder %s305_s28, %s301_s27 }
  0x26   :  { %v357_v24 = vmul.f32 %v229_v21, %v43_v6  ;;  %v359_v25 = vmul.f32 %v228_v22, %v42_v1  ;;  %v231_v26 = vsel %vm65_vm6, 1.0, %v334_v20  ;;  %v98_v38 = vsel %vm78_vm8, %v229_v21, 0.0 }
  0x27   :  { %vm64_vm7 = vcmp.ne.s32.totalorder %v60_v23, 0  ;;  %v361_v27 = vmul.f32 %v231_v26, %v45_v2  ;;  %v95_v39 = vsel %vm78_vm8, %v228_v22, 0.0  ;;  %v104_v40 = vsel %vm78_vm8, %v231_v26, 0.0  ;;  %p308_p13 = por %p307_p12, %p306_p11 }
  0x28   :  { %v230_v28 = vsel %vm64_vm7, 1.0, %v334_v20  ;;  %v114_v46 = vshrl.u32 %v111_v42, 7  ;;  %v117_v47 = vadd.s32 4294967288, %v112_v43  ;;  %vm122_vm9 = vcmask 130112  }
  0x29   :  { %v363_v29 = vmul.f32 %v230_v28, %v44_v0  ;;  %v101_v41 = vsel %vm78_vm8, %v230_v28, 0.0  ;;  %vm133_vm10 = vcmask 1041409   ;;  %vm136_vm11 = vcmask 123904   ;;  %p309_p0 = pnand %p308_p13, %p302_p10 }
  0x2a   :  { %v115_v50 = vsub.s32 %v112_v43, %v114_v46  ;;  %v120_v51 = vsub.s32 %v117_v47, %v114_v46  ;;  %v80_v12 = vsel %vm78_vm8, %v357_v24, 0.0  ;;  %v79_v13 = vsel %vm78_vm8, %v359_v25, 0.0 }
  0x2b   :  { %v81_v18 = vadd.f32 %v80_v12, %v79_v13  ;;  %v82_v19 = vsel %vm78_vm8, %v363_v29, 0.0  ;;  %v84_v21 = vsel %vm78_vm8, %v361_v27, 0.0  ;;  %vm196_vm12 = vcmask 1024  }
  0x2c   :  { %vm210_vm13 = vcmask 0  }
  0x2d   :  { %v246_v30 = vpop.eup %245  ;;  %v83_v20 = vadd.f32 %v82_v19, %v81_v18 }
  0x2e   :  { %v248_v31 = vpop.eup %247  ;;  %v154_v32 = vsel %vm78_vm8, %v246_v30, 0.0 }
  0x2f   :  { %v250_v33 = vpop.eup %249  ;;  %155 = vadd.xlane.f32.xlu1 %v154_v32  ;;  %v148_v34 = vsel %vm78_vm8, %v248_v31, 0.0  ;;  %v85_v22 = vadd.f32 %v84_v21, %v83_v20 }
  0x30   :  { %v252_v35 = vpop.eup %251  ;;  %149 = vadd.xlane.f32.xlu0 %v148_v34  ;;  %v157_v36 = vsel %vm78_vm8, %v250_v33, 0.0 }
  0x31   :  { %v151_v37 = vsel %vm78_vm8, %v252_v35, 0.0 }
  0x33   :  { %158 = vadd.xlane.f32.xlu1 %v157_v36 }
  0x34   :  { %152 = vadd.xlane.f32.xlu0 %v151_v37 }
  0x37   :  { %99 = vadd.xlane.f32.xlu1 %v98_v38 }
  0x38   :  { %96 = vadd.xlane.f32.xlu0 %v95_v39 }
  0x3b   :  { %105 = vadd.xlane.f32.xlu1 %v104_v40 }
  0x3c   :  { %102 = vadd.xlane.f32.xlu0 %v101_v41 }
  0xb8   :  { %v156_v44 = vpop.xlane.xlu1 %155 }
  0xb9   :  { %253 = vlog2.f32 %v156_v44  ;;  %v150_v45 = vpop.xlane.xlu0 %149 }
  0xba   :  { %255 = vlog2.f32 %v150_v45 }
  0xbc   :  { %v159_v48 = vpop.xlane.xlu1 %158 }
  0xbd   :  { %257 = vlog2.f32 %v159_v48  ;;  %v153_v49 = vpop.xlane.xlu0 %152 }
  0xbe   :  { %259 = vlog2.f32 %v153_v49 }
  0xc0   :  { %v100_v52 = vpop.xlane.xlu1 %99 }
  0xc1   :  { %v97_v53 = vpop.xlane.xlu0 %96  ;;  %v121_v54 = vrot.slane %v100_v52, %v120_v51 }
  0xc2   :  { %v116_v55 = vrot.slane %v97_v53, %v115_v50 }
  0xc4   :  { %v106_v56 = vpop.xlane.xlu1 %105  ;;  %v123_v61 = vsel %vm122_vm9, %v121_v54, %v116_v55 }
  0xc5   :  { %v131_v57 = vrot.slane %v106_v56, %v120_v51  ;;  %v103_v58 = vpop.xlane.xlu0 %102 }
  0xc6   :  { %v254_v59 = vpop.eup %253  ;;  %v127_v60 = vrot.slane %v103_v58, %v115_v50 }
  0xc7   :  { %v256_v62 = vpop.eup %255  ;;  %v165_v0 = vmul.f32 0.6931472, %v254_v59 }
  0xc8   :  { %v132_v63 = vsel %vm122_vm9, %v131_v57, %v127_v60  ;;  %v161_v3 = vmul.f32 0.6931472, %v256_v62 }
  0xc9   :  { %v134_v1 = vsel %vm133_vm10, %v132_v63, %v123_v61  ;;  %v184_v8 = vrot.slane %v165_v0, %v115_v50 }
  0xca   :  { %v258_v2 = vpop.eup %257  ;;  %v137_v4 = vsel %vm136_vm11, %v134_v1, 0.0  ;;  %v175_v10 = vrot.slane %v161_v3, %v115_v50 }
  0xcb   :  { %v260_v5 = vpop.eup %259  ;;  %v167_v6 = vmul.f32 0.6931472, %v258_v2  ;;  %138 = vadd.xlane.f32.xlu0 %v137_v4 }
  0xcc   :  { %v163_v7 = vmul.f32 0.6931472, %v260_v5 }
  0xcd   :  { %v188_v9 = vrot.slane %v167_v6, %v120_v51 }
  0xce   :  { %v179_v11 = vrot.slane %v163_v7, %v120_v51 }
  0xcf   :  { %v189_v14 = vsel %vm122_vm9, %v188_v9, %v184_v8  ;;  %86 = vadd.xlane.f32.xlu0 %v85_v22 }
  0xd0   :  { %v180_v15 = vsel %vm122_vm9, %v179_v11, %v175_v10 }
  0xd1   :  { %v190_v16 = vsel %vm133_vm10, %v189_v14, %v180_v15 }
  0xd2   :  { %v192_v17 = vsel %vm136_vm11, %v190_v16, 0.0 }
  0xd3   :  { %193 = vadd.xlane.f32.xlu1 %v192_v17 }
 0x154   :  { %v139_v23 = vpop.xlane.xlu0 %138 }
 0x158   :  { %v87_v28 = vpop.xlane.xlu0 %86 }
 0x159   :  { %v88_v30 = vrot.slane %v87_v28, 4 }
 0x15b   :  { %v89_v31 = vadd.f32 %v88_v30, %v87_v28 }
 0x15c   :  { %v194_v24 = vpop.xlane.xlu1 %193 }
 0x15d   :  { %v195_v25 = vmul.f32 %v194_v24, %v139_v23  ;;  %v90_v32 = vrot.slane %v89_v31, 2 }
 0x15f   :  { %v197_v26 = vsel %vm196_vm12, %v195_v25, 0.0  ;;  %v91_v33 = vadd.f32 %v90_v32, %v89_v31 }
 0x160   :  { %198 = vadd.xlane.f32.xlu1 %v197_v26 }
 0x161   :  { %v92_v34 = vrot.slane %v91_v33, 1 }
 0x163   :  { %v93_v35 = vadd.f32 %v92_v34, %v91_v33 }
 0x165   :  { %232 = vpush %v93_v35 }
 0x196   :  { %s233_s0 = spop %232 }
 0x197   :  { %s207_s1 = smul.f32 16.0, %s233_s0 }
 0x1e9   :  { %v199_v29 = vpop.xlane.xlu1 %198 }
 0x1ea   :  { %v200_v36 = vrot.slane %v199_v29, 4 }
 0x1ec   :  { %v201_v37 = vadd.f32 %v200_v36, %v199_v29 }
 0x1ee   :  { %v202_v27 = vrot.slane %v201_v37, 2 }
 0x1f0   :  { %v203_v38 = vadd.f32 %v202_v27, %v201_v37 }
 0x1f2   :  { %v204_v39 = vrot.slane %v203_v38, 1 }
 0x1f4   :  { %v205_v40 = vadd.f32 %v204_v39, %v203_v38 }
 0x1f6   :  { %234 = vpush %v205_v40 }
 0x227   :  { %s235_s25 = spop %234 }
 0x228   :  { %s208_s26 = ssub.f32 %s207_s1, %s235_s25 }
 0x22a   :  { %v209_v41 = vstv %s208_s26 }
 0x22b   :  { %211 = vst.msk [vmem:[#allocation7] sm:$0x1] %vm210_vm13, %v209_v41 }
 0x22c   :  { %312 = shalt.err (!%p309_p0)
}
 0x22d   :  { %221 = dma.vmem_to_hbm [thread:$0]  %s219_s24, 16, %s394_s2, [#allocation4]  }
 0x22e   :  { %325 = dma.done.wait [#allocation4], 16  }
 0x22f   :  { %326 = vsyncadd [#allocation4], 4294967280 }
 0x230   :  { %225 = vsyncpa [#allocation3], 1 }
 0x231   :  { %226 = vsyncpa [#allocation6], 1 }
 0x232   :  { %227 = vsyncpa [#allocation4], 1 }

</bundles_post_ra>
